<compile_context>
chip_gen: v5e
topology: v5e:2x2
jax: 0.10.0
libtpu: 0.0.40
codegen_flags: <defaults>
</compile_context>

<pallas_src>
import functools

import jax
import jax.numpy as jnp
import numpy as np
from jax import lax
from jax.experimental import pallas as pl
from jax.experimental.pallas import tpu as pltpu

ALPHA = 0.25   # focal_alpha (module default)
GAMMA = 2.0
EPS = 1e-8
LANE = 128     # T tile width (lane dimension)


def _recip(x):
    # EUP approximate reciprocal + one Newton step (~f32 accuracy, divide-free).
    r = pl.reciprocal(x, approx=True)
    return r * (2.0 - x * r)


def _matcher_kernel(logits_ref, boxes_ref, onehot_ref, tgt_boxes_t_ref,
                    c_ref, idx_ref, *, bs, nq, w_class, w_bbox, w_giou):
    logits = logits_ref[...].astype(jnp.float32)          # [N, C]   N = bs*nq
    out_bbox = boxes_ref[...].astype(jnp.float32)         # [N, 4]   cxcywh
    onehot = onehot_ref[...].astype(jnp.float32)          # [C, Tt]  0/1 (bf16 in)
    tgt_t = tgt_boxes_t_ref[...].astype(jnp.float32)      # [4, Tt]  cxcywh rows

    Tt = onehot.shape[1]

    # ---- focal classification cost (gather logits first, then focal) -------
    # Gather at tgt_ids == exact matmul with 0/1 one-hot (HIGHEST precision).
    glogit = jnp.dot(logits, onehot,
                     preferred_element_type=jnp.float32,
                     precision=lax.Precision.HIGHEST)      # [N, Tt]
    prob = jax.nn.sigmoid(glogit)
    one_m = 1.0 - prob
    neg_cost = (1.0 - ALPHA) * (prob * prob) * (-jnp.log(one_m + EPS))
    pos_cost = ALPHA * (one_m * one_m) * (-jnp.log(prob + EPS))
    cost_class = pos_cost - neg_cost                       # [N, Tt]

    def ocol(k):  # prediction coordinate k as column  [N, 1]
        return out_bbox[:, k:k + 1]

    def trow(k):  # target coordinate k as row          [1, Tt]
        return tgt_t[k:k + 1, :]

    # ---- L1 cdist (coords unrolled, lane-dense in T) ------------------------
    cost_bbox = jnp.abs(ocol(0) - trow(0))
    for k in range(1, 4):
        cost_bbox = cost_bbox + jnp.abs(ocol(k) - trow(k))

    # ---- pairwise GIoU -------------------------------------------------------
    # cxcywh -> xyxy
    ox1 = ocol(0) - 0.5 * ocol(2); oy1 = ocol(1) - 0.5 * ocol(3)
    ox2 = ocol(0) + 0.5 * ocol(2); oy2 = ocol(1) + 0.5 * ocol(3)
    tx1 = trow(0) - 0.5 * trow(2); ty1 = trow(1) - 0.5 * trow(3)
    tx2 = trow(0) + 0.5 * trow(2); ty2 = trow(1) + 0.5 * trow(3)

    area_o = (ox2 - ox1) * (oy2 - oy1)                     # [N, 1]
    area_t = (tx2 - tx1) * (ty2 - ty1)                     # [1, Tt]

    iw = jnp.maximum(jnp.minimum(ox2, tx2) - jnp.maximum(ox1, tx1), 0.0)
    ih = jnp.maximum(jnp.minimum(oy2, ty2) - jnp.maximum(oy1, ty1), 0.0)
    inter = iw * ih
    union = area_o + area_t - inter
    iou = inter * _recip(union)          # no eps, matching the torch reference

    ew = jnp.maximum(jnp.maximum(ox2, tx2) - jnp.minimum(ox1, tx1), 0.0)
    eh = jnp.maximum(jnp.maximum(oy2, ty2) - jnp.minimum(oy1, ty1), 0.0)
    enclose = ew * eh
    giou = iou - (enclose - union) * _recip(enclose)

    # ---- weighted total + per-batch argmin over queries ---------------------
    C = w_bbox * cost_bbox + w_class * cost_class - w_giou * giou   # [N, Tt]
    c_ref[...] = C

    # argmin over queries (axis 0 within each batch's query block) with
    # first-occurrence tie-break (matches torch.min(0)[1]).
    q_iota = lax.broadcasted_iota(jnp.int32, (nq, Tt), 0)
    rows = []
    for b in range(bs):                               # static unroll (bs small)
        Cb = C[b * nq:(b + 1) * nq, :]                # [nq, Tt]
        mn = jnp.min(Cb, axis=0, keepdims=True)       # [1, Tt]
        rows.append(jnp.min(jnp.where(Cb <= mn, q_iota, nq),
                            axis=0, keepdims=True))   # [1, Tt]
    idx_ref[...] = jnp.concatenate(rows, axis=0).astype(jnp.int32)


def simple_minsum_matcher(pred_logits, pred_boxes, tgt_labels_list, tgt_boxes_list,
                          cost_class=1.0, cost_bbox=1.0, cost_giou=1.0):
    bs, nq, num_classes = pred_logits.shape
    N = bs * nq
    sizes = [int(l.shape[0]) for l in tgt_labels_list]
    tgt_ids = jnp.concatenate(tgt_labels_list)                      # [T]
    tgt_bbox = jnp.concatenate(tgt_boxes_list, axis=0)              # [T, 4]
    T = int(tgt_ids.shape[0])

    # ---- pad T up to a lane-dense multiple of 128 ---------------------------
    T_pad = max(LANE, ((T + LANE - 1) // LANE) * LANE)
    pad = T_pad - T

    onehot = jax.nn.one_hot(tgt_ids, num_classes, dtype=jnp.float32).T   # [C, T]
    if pad:
        onehot = jnp.pad(onehot, ((0, 0), (0, pad)))                     # zero cols
    onehot = onehot.astype(jnp.bfloat16)        # 0/1 exact in bf16, half the DMA

    tgt_boxes_t = tgt_bbox.T.astype(jnp.float32)                          # [4, T]
    if pad:
        # non-degenerate dummy boxes keep padded lanes finite (sliced off below)
        dummy = jnp.tile(jnp.array([[0.5], [0.5], [1.0], [1.0]], jnp.float32),
                         (1, pad))
        tgt_boxes_t = jnp.concatenate([tgt_boxes_t, dummy], axis=1)       # [4, T_pad]

    logits2d = pred_logits.reshape(N, num_classes).astype(jnp.float32)
    boxes2d = pred_boxes.reshape(N, 4).astype(jnp.float32)

    kernel = functools.partial(_matcher_kernel,
                               bs=bs, nq=nq,
                               w_class=float(cost_class),
                               w_bbox=float(cost_bbox),
                               w_giou=float(cost_giou))

    n_tiles = T_pad // LANE
    C_full, idx_full = pl.pallas_call(
        kernel,
        out_shape=(jax.ShapeDtypeStruct((N, T_pad), jnp.float32),
                   jax.ShapeDtypeStruct((bs, T_pad), jnp.int32)),
        grid=(n_tiles,),
        in_specs=[
            pl.BlockSpec((N, num_classes), lambda t: (0, 0)),   # resident across T tiles
            pl.BlockSpec((N, 4), lambda t: (0, 0)),
            pl.BlockSpec((num_classes, LANE), lambda t: (0, t)),
            pl.BlockSpec((4, LANE), lambda t: (0, t)),
        ],
        out_specs=(
            pl.BlockSpec((N, LANE), lambda t: (0, t)),
            pl.BlockSpec((bs, LANE), lambda t: (0, t)),
        ),
        compiler_params=pltpu.CompilerParams(dimension_semantics=("parallel",)),
    )(logits2d, boxes2d, onehot, tgt_boxes_t)

    # slice off the padded lanes, restore [bs, nq, T] view of the cost matrix
    C = C_full.reshape(bs, nq, T_pad)[:, :, :T]

    # host glue: split per-batch variable-length segments (like C.split(sizes))
    indices = []
    off = 0
    for i, sz in enumerate(sizes):
        idx_i = idx_full[i, off:off + sz].astype(jnp.int32)
        idx_j = jnp.arange(sz, dtype=jnp.int32)
        indices.append((idx_i, idx_j))
        off += sz
    return indices, C


# ---------------- pure-JAX reference (for validation) ------------------------
def _reference(pred_logits, pred_boxes, labels, boxes,
               cost_class=1.0, cost_bbox=1.0, cost_giou=1.0, alpha=ALPHA):
    bs, nq, ncls = pred_logits.shape
    out_prob = jax.nn.sigmoid(pred_logits.reshape(bs * nq, ncls))
    tgt_ids = jnp.concatenate(labels)
    neg = (1 - alpha) * out_prob ** 2.0 * (-jnp.log(1 - out_prob + EPS))
    pos = alpha * (1 - out_prob) ** 2.0 * (-jnp.log(out_prob + EPS))
    cc = pos[:, tgt_ids] - neg[:, tgt_ids]
    out_bbox = pred_boxes.reshape(bs * nq, 4)
    tgt_bbox = jnp.concatenate(boxes, 0)
    cb = jnp.sum(jnp.abs(out_bbox[:, None, :] - tgt_bbox[None, :, :]), -1)

    def to_xyxy(b):
        cx, cy, w, h = b[..., 0], b[..., 1], b[..., 2], b[..., 3]
        return jnp.stack([cx - w / 2, cy - h / 2, cx + w / 2, cy + h / 2], -1)

    b1, b2 = to_xyxy(out_bbox), to_xyxy(tgt_bbox)
    a1 = (b1[:, 2] - b1[:, 0]) * (b1[:, 3] - b1[:, 1])
    a2 = (b2[:, 2] - b2[:, 0]) * (b2[:, 3] - b2[:, 1])
    lt = jnp.maximum(b1[:, None, :2], b2[None, :, :2])
    rb = jnp.minimum(b1[:, None, 2:], b2[None, :, 2:])
    wh = jnp.clip(rb - lt, 0)
    inter = wh[..., 0] * wh[..., 1]
    union = a1[:, None] + a2[None, :] - inter
    iou = inter / union
    lt2 = jnp.minimum(b1[:, None, :2], b2[None, :, :2])
    rb2 = jnp.maximum(b1[:, None, 2:], b2[None, :, 2:])
    wh2 = jnp.clip(rb2 - lt2, 0)
    area = wh2[..., 0] * wh2[..., 1]
    giou = iou - (area - union) / area
    C = cost_bbox * cb + cost_class * cc + cost_giou * (-giou)
    C = C.reshape(bs, nq, -1)
    sizes = [int(b.shape[0]) for b in boxes]
    indices, off = [], 0
    for i, sz in enumerate(sizes):
        w = C[i, :, off:off + sz]
        indices.append((jnp.argmin(w, axis=0).astype(jnp.int32),
                        jnp.arange(sz, dtype=jnp.int32)))
        off += sz
    return indices, C


if __name__ == "__main__":
    key = jax.random.PRNGKey(0)
    bs, nq, num_classes = 2, 16, 32
    sizes = [4, 6]

    k1, k2, k3, k4 = jax.random.split(key, 4)
    pred_logits = jax.random.normal(k1, (bs, nq, num_classes), jnp.float32)
    pred_boxes = jax.nn.sigmoid(jax.random.normal(k2, (bs, nq, 4), jnp.float32))

    kl = jax.random.split(k3, len(sizes))
    kb = jax.random.split(k4, len(sizes))
    tgt_labels = [jax.random.randint(kl[i], (sz,), 0, num_classes, jnp.int32)
                  for i, sz in enumerate(sizes)]
    tgt_boxes = [jax.nn.sigmoid(jax.random.normal(kb[i], (sz, 4), jnp.float32))
                 for i, sz in enumerate(sizes)]

    indices, C = simple_minsum_matcher(pred_logits, pred_boxes, tgt_labels, tgt_boxes)
    jax.block_until_ready(C)
    for (ii, jj) in indices:
        jax.block_until_ready(ii)
        jax.block_until_ready(jj)

    # validate against pure-JAX reference
    ref_indices, ref_C = _reference(pred_logits, pred_boxes, tgt_labels, tgt_boxes)
    np.testing.assert_allclose(np.asarray(C), np.asarray(ref_C), rtol=1e-4, atol=1e-4)
    for (ii, jj), (ri, rj) in zip(indices, ref_indices):
        np.testing.assert_array_equal(np.asarray(ii), np.asarray(ri))
        np.testing.assert_array_equal(np.asarray(jj), np.asarray(rj))

    print("KERNEL_OK")
</pallas_src>

<mosaic_0001>
module attributes {stable_mosaic.version = 11 : i64} {
  func.func @_matcher_kernel(%arg0: i32, %arg1: memref<32x32xf32, #tpu.memory_space<vmem>>, %arg2: memref<32x4xf32, #tpu.memory_space<vmem>>, %arg3: memref<32x128xbf16, #tpu.memory_space<vmem>>, %arg4: memref<4x128xf32, #tpu.memory_space<vmem>>, %arg5: memref<32x128xf32, #tpu.memory_space<vmem>>, %arg6: memref<2x128xi32, #tpu.memory_space<vmem>>) attributes {dimension_semantics = [#tpu.dimension_semantics<parallel>], iteration_bounds = array<i64: 1>, scalar_prefetch = 0 : i64, scratch_operands = 0 : i64, tpu.core_type = #tpu.core_type<tc>, window_params = [{pipeline_mode = #tpu.pipeline_mode<synchronous>, transform_indices = @transform_0, window_bounds = array<i64: 32, 32>}, {pipeline_mode = #tpu.pipeline_mode<synchronous>, transform_indices = @transform_1, window_bounds = array<i64: 32, 4>}, {transform_indices = @transform_2, window_bounds = array<i64: 32, 128>}, {transform_indices = @transform_3, window_bounds = array<i64: 4, 128>}, {transform_indices = @transform_4, window_bounds = array<i64: 32, 128>}, {transform_indices = @transform_5, window_bounds = array<i64: 2, 128>}]} {
    %c0 = arith.constant 0 : index
    %c0_0 = arith.constant 0 : index
    %0 = vector.load %arg1[%c0, %c0_0] : memref<32x32xf32, #tpu.memory_space<vmem>>, vector<32x32xf32>
    %c0_1 = arith.constant 0 : index
    %c0_2 = arith.constant 0 : index
    %1 = vector.load %arg2[%c0_1, %c0_2] : memref<32x4xf32, #tpu.memory_space<vmem>>, vector<32x4xf32>
    %c0_3 = arith.constant 0 : index
    %c0_4 = arith.constant 0 : index
    %2 = vector.load %arg3[%c0_3, %c0_4] : memref<32x128xbf16, #tpu.memory_space<vmem>>, vector<32x128xbf16>
    %3 = arith.extf %2 : vector<32x128xbf16> to vector<32x128xf32>
    %c0_5 = arith.constant 0 : index
    %c0_6 = arith.constant 0 : index
    %4 = vector.load %arg4[%c0_5, %c0_6] : memref<4x128xf32, #tpu.memory_space<vmem>>, vector<4x128xf32>
    %cst = arith.constant dense<0.000000e+00> : vector<32x128xf32>
    %5 = tpu.matmul %0, %3, %cst {dimension_numbers = #tpu.dot_dimension_numbers<[1], [0], [0], [1], [0, 0, 1, 1], [], []>, precision = #tpu.contract_precision<fp32>} : vector<32x32xf32>, vector<32x128xf32>, vector<32x128xf32> -> vector<32x128xf32>
    %6 = arith.negf %5 : vector<32x128xf32>
    %7 = math.exp %6 : vector<32x128xf32>
    %cst_7 = arith.constant 1.000000e+00 : f32
    %8 = vector.broadcast %cst_7 : f32 to vector<32x128xf32>
    %9 = arith.addf %8, %7 : vector<32x128xf32>
    %10 = arith.divf %8, %9 : vector<32x128xf32>
    %cst_8 = arith.constant 1.000000e+00 : f32
    %11 = vector.broadcast %cst_8 : f32 to vector<32x128xf32>
    %12 = arith.subf %11, %10 : vector<32x128xf32>
    %13 = arith.mulf %10, %10 : vector<32x128xf32>
    %cst_9 = arith.constant 7.500000e-01 : f32
    %14 = vector.broadcast %cst_9 : f32 to vector<32x128xf32>
    %15 = arith.mulf %14, %13 : vector<32x128xf32>
    %cst_10 = arith.constant 9.99999993E-9 : f32
    %16 = vector.broadcast %cst_10 : f32 to vector<32x128xf32>
    %17 = arith.addf %12, %16 : vector<32x128xf32>
    %18 = math.log %17 : vector<32x128xf32>
    %cst_11 = arith.constant 0.000000e+00 : f32
    %19 = vector.broadcast %cst_11 : f32 to vector<32x128xf32>
    %20 = arith.subf %19, %18 : vector<32x128xf32>
    %21 = arith.mulf %15, %20 : vector<32x128xf32>
    %22 = arith.mulf %12, %12 : vector<32x128xf32>
    %cst_12 = arith.constant 2.500000e-01 : f32
    %23 = vector.broadcast %cst_12 : f32 to vector<32x128xf32>
    %24 = arith.mulf %23, %22 : vector<32x128xf32>
    %cst_13 = arith.constant 9.99999993E-9 : f32
    %25 = vector.broadcast %cst_13 : f32 to vector<32x128xf32>
    %26 = arith.addf %10, %25 : vector<32x128xf32>
    %27 = math.log %26 : vector<32x128xf32>
    %cst_14 = arith.constant 0.000000e+00 : f32
    %28 = vector.broadcast %cst_14 : f32 to vector<32x128xf32>
    %29 = arith.subf %28, %27 : vector<32x128xf32>
    %30 = arith.mulf %24, %29 : vector<32x128xf32>
    %31 = arith.subf %30, %21 : vector<32x128xf32>
    %32 = vector.extract_strided_slice %1 {offsets = [0, 0], sizes = [32, 1], strides = [1, 1]} : vector<32x4xf32> to vector<32x1xf32>
    %33 = vector.extract_strided_slice %4 {offsets = [0, 0], sizes = [1, 128], strides = [1, 1]} : vector<4x128xf32> to vector<1x128xf32>
    %34 = vector.broadcast %32 : vector<32x1xf32> to vector<32x128xf32>
    %35 = vector.broadcast %33 : vector<1x128xf32> to vector<32x128xf32>
    %36 = arith.subf %34, %35 : vector<32x128xf32>
    %37 = math.absf %36 : vector<32x128xf32>
    %38 = vector.extract_strided_slice %1 {offsets = [0, 1], sizes = [32, 1], strides = [1, 1]} : vector<32x4xf32> to vector<32x1xf32>
    %39 = vector.extract_strided_slice %4 {offsets = [1, 0], sizes = [1, 128], strides = [1, 1]} : vector<4x128xf32> to vector<1x128xf32>
    %40 = vector.broadcast %38 : vector<32x1xf32> to vector<32x128xf32>
    %41 = vector.broadcast %39 : vector<1x128xf32> to vector<32x128xf32>
    %42 = arith.subf %40, %41 : vector<32x128xf32>
    %43 = math.absf %42 : vector<32x128xf32>
    %44 = arith.addf %37, %43 : vector<32x128xf32>
    %45 = vector.extract_strided_slice %1 {offsets = [0, 2], sizes = [32, 1], strides = [1, 1]} : vector<32x4xf32> to vector<32x1xf32>
    %46 = vector.extract_strided_slice %4 {offsets = [2, 0], sizes = [1, 128], strides = [1, 1]} : vector<4x128xf32> to vector<1x128xf32>
    %47 = vector.broadcast %45 : vector<32x1xf32> to vector<32x128xf32>
    %48 = vector.broadcast %46 : vector<1x128xf32> to vector<32x128xf32>
    %49 = arith.subf %47, %48 : vector<32x128xf32>
    %50 = math.absf %49 : vector<32x128xf32>
    %51 = arith.addf %44, %50 : vector<32x128xf32>
    %52 = vector.extract_strided_slice %1 {offsets = [0, 3], sizes = [32, 1], strides = [1, 1]} : vector<32x4xf32> to vector<32x1xf32>
    %53 = vector.extract_strided_slice %4 {offsets = [3, 0], sizes = [1, 128], strides = [1, 1]} : vector<4x128xf32> to vector<1x128xf32>
    %54 = vector.broadcast %52 : vector<32x1xf32> to vector<32x128xf32>
    %55 = vector.broadcast %53 : vector<1x128xf32> to vector<32x128xf32>
    %56 = arith.subf %54, %55 : vector<32x128xf32>
    %57 = math.absf %56 : vector<32x128xf32>
    %58 = arith.addf %51, %57 : vector<32x128xf32>
    %59 = vector.extract_strided_slice %1 {offsets = [0, 0], sizes = [32, 1], strides = [1, 1]} : vector<32x4xf32> to vector<32x1xf32>
    %60 = vector.extract_strided_slice %1 {offsets = [0, 2], sizes = [32, 1], strides = [1, 1]} : vector<32x4xf32> to vector<32x1xf32>
    %cst_15 = arith.constant 5.000000e-01 : f32
    %61 = vector.broadcast %cst_15 : f32 to vector<32x1xf32>
    %62 = arith.mulf %61, %60 : vector<32x1xf32>
    %63 = arith.subf %59, %62 : vector<32x1xf32>
    %64 = vector.extract_strided_slice %1 {offsets = [0, 1], sizes = [32, 1], strides = [1, 1]} : vector<32x4xf32> to vector<32x1xf32>
    %65 = vector.extract_strided_slice %1 {offsets = [0, 3], sizes = [32, 1], strides = [1, 1]} : vector<32x4xf32> to vector<32x1xf32>
    %cst_16 = arith.constant 5.000000e-01 : f32
    %66 = vector.broadcast %cst_16 : f32 to vector<32x1xf32>
    %67 = arith.mulf %66, %65 : vector<32x1xf32>
    %68 = arith.subf %64, %67 : vector<32x1xf32>
    %69 = vector.extract_strided_slice %1 {offsets = [0, 0], sizes = [32, 1], strides = [1, 1]} : vector<32x4xf32> to vector<32x1xf32>
    %70 = vector.extract_strided_slice %1 {offsets = [0, 2], sizes = [32, 1], strides = [1, 1]} : vector<32x4xf32> to vector<32x1xf32>
    %cst_17 = arith.constant 5.000000e-01 : f32
    %71 = vector.broadcast %cst_17 : f32 to vector<32x1xf32>
    %72 = arith.mulf %71, %70 : vector<32x1xf32>
    %73 = arith.addf %69, %72 : vector<32x1xf32>
    %74 = vector.extract_strided_slice %1 {offsets = [0, 1], sizes = [32, 1], strides = [1, 1]} : vector<32x4xf32> to vector<32x1xf32>
    %75 = vector.extract_strided_slice %1 {offsets = [0, 3], sizes = [32, 1], strides = [1, 1]} : vector<32x4xf32> to vector<32x1xf32>
    %cst_18 = arith.constant 5.000000e-01 : f32
    %76 = vector.broadcast %cst_18 : f32 to vector<32x1xf32>
    %77 = arith.mulf %76, %75 : vector<32x1xf32>
    %78 = arith.addf %74, %77 : vector<32x1xf32>
    %79 = vector.extract_strided_slice %4 {offsets = [0, 0], sizes = [1, 128], strides = [1, 1]} : vector<4x128xf32> to vector<1x128xf32>
    %80 = vector.extract_strided_slice %4 {offsets = [2, 0], sizes = [1, 128], strides = [1, 1]} : vector<4x128xf32> to vector<1x128xf32>
    %cst_19 = arith.constant 5.000000e-01 : f32
    %81 = vector.broadcast %cst_19 : f32 to vector<1x128xf32>
    %82 = arith.mulf %81, %80 : vector<1x128xf32>
    %83 = arith.subf %79, %82 : vector<1x128xf32>
    %84 = vector.extract_strided_slice %4 {offsets = [1, 0], sizes = [1, 128], strides = [1, 1]} : vector<4x128xf32> to vector<1x128xf32>
    %85 = vector.extract_strided_slice %4 {offsets = [3, 0], sizes = [1, 128], strides = [1, 1]} : vector<4x128xf32> to vector<1x128xf32>
    %cst_20 = arith.constant 5.000000e-01 : f32
    %86 = vector.broadcast %cst_20 : f32 to vector<1x128xf32>
    %87 = arith.mulf %86, %85 : vector<1x128xf32>
    %88 = arith.subf %84, %87 : vector<1x128xf32>
    %89 = vector.extract_strided_slice %4 {offsets = [0, 0], sizes = [1, 128], strides = [1, 1]} : vector<4x128xf32> to vector<1x128xf32>
    %90 = vector.extract_strided_slice %4 {offsets = [2, 0], sizes = [1, 128], strides = [1, 1]} : vector<4x128xf32> to vector<1x128xf32>
    %cst_21 = arith.constant 5.000000e-01 : f32
    %91 = vector.broadcast %cst_21 : f32 to vector<1x128xf32>
    %92 = arith.mulf %91, %90 : vector<1x128xf32>
    %93 = arith.addf %89, %92 : vector<1x128xf32>
    %94 = vector.extract_strided_slice %4 {offsets = [1, 0], sizes = [1, 128], strides = [1, 1]} : vector<4x128xf32> to vector<1x128xf32>
    %95 = vector.extract_strided_slice %4 {offsets = [3, 0], sizes = [1, 128], strides = [1, 1]} : vector<4x128xf32> to vector<1x128xf32>
    %cst_22 = arith.constant 5.000000e-01 : f32
    %96 = vector.broadcast %cst_22 : f32 to vector<1x128xf32>
    %97 = arith.mulf %96, %95 : vector<1x128xf32>
    %98 = arith.addf %94, %97 : vector<1x128xf32>
    %99 = arith.subf %73, %63 : vector<32x1xf32>
    %100 = arith.subf %78, %68 : vector<32x1xf32>
    %101 = arith.mulf %99, %100 : vector<32x1xf32>
    %102 = arith.subf %93, %83 : vector<1x128xf32>
    %103 = arith.subf %98, %88 : vector<1x128xf32>
    %104 = arith.mulf %102, %103 : vector<1x128xf32>
    %105 = vector.broadcast %73 : vector<32x1xf32> to vector<32x128xf32>
    %106 = vector.broadcast %93 : vector<1x128xf32> to vector<32x128xf32>
    %107 = arith.minimumf %105, %106 : vector<32x128xf32>
    %108 = vector.broadcast %63 : vector<32x1xf32> to vector<32x128xf32>
    %109 = vector.broadcast %83 : vector<1x128xf32> to vector<32x128xf32>
    %110 = arith.maximumf %108, %109 : vector<32x128xf32>
    %111 = arith.subf %107, %110 : vector<32x128xf32>
    %cst_23 = arith.constant 0.000000e+00 : f32
    %112 = vector.broadcast %cst_23 : f32 to vector<32x128xf32>
    %113 = arith.maximumf %111, %112 : vector<32x128xf32>
    %114 = vector.broadcast %78 : vector<32x1xf32> to vector<32x128xf32>
    %115 = vector.broadcast %98 : vector<1x128xf32> to vector<32x128xf32>
    %116 = arith.minimumf %114, %115 : vector<32x128xf32>
    %117 = vector.broadcast %68 : vector<32x1xf32> to vector<32x128xf32>
    %118 = vector.broadcast %88 : vector<1x128xf32> to vector<32x128xf32>
    %119 = arith.maximumf %117, %118 : vector<32x128xf32>
    %120 = arith.subf %116, %119 : vector<32x128xf32>
    %cst_24 = arith.constant 0.000000e+00 : f32
    %121 = vector.broadcast %cst_24 : f32 to vector<32x128xf32>
    %122 = arith.maximumf %120, %121 : vector<32x128xf32>
    %123 = arith.mulf %113, %122 : vector<32x128xf32>
    %124 = vector.broadcast %101 : vector<32x1xf32> to vector<32x128xf32>
    %125 = vector.broadcast %104 : vector<1x128xf32> to vector<32x128xf32>
    %126 = arith.addf %124, %125 : vector<32x128xf32>
    %127 = arith.subf %126, %123 : vector<32x128xf32>
    %128 = tpu.reciprocal %127 {approx = true} : vector<32x128xf32> -> vector<32x128xf32>
    %129 = arith.mulf %127, %128 : vector<32x128xf32>
    %cst_25 = arith.constant 2.000000e+00 : f32
    %130 = vector.broadcast %cst_25 : f32 to vector<32x128xf32>
    %131 = arith.subf %130, %129 : vector<32x128xf32>
    %132 = arith.mulf %128, %131 : vector<32x128xf32>
    %133 = arith.mulf %123, %132 : vector<32x128xf32>
    %134 = vector.broadcast %73 : vector<32x1xf32> to vector<32x128xf32>
    %135 = vector.broadcast %93 : vector<1x128xf32> to vector<32x128xf32>
    %136 = arith.maximumf %134, %135 : vector<32x128xf32>
    %137 = vector.broadcast %63 : vector<32x1xf32> to vector<32x128xf32>
    %138 = vector.broadcast %83 : vector<1x128xf32> to vector<32x128xf32>
    %139 = arith.minimumf %137, %138 : vector<32x128xf32>
    %140 = arith.subf %136, %139 : vector<32x128xf32>
    %cst_26 = arith.constant 0.000000e+00 : f32
    %141 = vector.broadcast %cst_26 : f32 to vector<32x128xf32>
    %142 = arith.maximumf %140, %141 : vector<32x128xf32>
    %143 = vector.broadcast %78 : vector<32x1xf32> to vector<32x128xf32>
    %144 = vector.broadcast %98 : vector<1x128xf32> to vector<32x128xf32>
    %145 = arith.maximumf %143, %144 : vector<32x128xf32>
    %146 = vector.broadcast %68 : vector<32x1xf32> to vector<32x128xf32>
    %147 = vector.broadcast %88 : vector<1x128xf32> to vector<32x128xf32>
    %148 = arith.minimumf %146, %147 : vector<32x128xf32>
    %149 = arith.subf %145, %148 : vector<32x128xf32>
    %cst_27 = arith.constant 0.000000e+00 : f32
    %150 = vector.broadcast %cst_27 : f32 to vector<32x128xf32>
    %151 = arith.maximumf %149, %150 : vector<32x128xf32>
    %152 = arith.mulf %142, %151 : vector<32x128xf32>
    %153 = arith.subf %152, %127 : vector<32x128xf32>
    %154 = tpu.reciprocal %152 {approx = true} : vector<32x128xf32> -> vector<32x128xf32>
    %155 = arith.mulf %152, %154 : vector<32x128xf32>
    %cst_28 = arith.constant 2.000000e+00 : f32
    %156 = vector.broadcast %cst_28 : f32 to vector<32x128xf32>
    %157 = arith.subf %156, %155 : vector<32x128xf32>
    %158 = arith.mulf %154, %157 : vector<32x128xf32>
    %159 = arith.mulf %153, %158 : vector<32x128xf32>
    %160 = arith.subf %133, %159 : vector<32x128xf32>
    %cst_29 = arith.constant 1.000000e+00 : f32
    %161 = vector.broadcast %cst_29 : f32 to vector<32x128xf32>
    %162 = arith.mulf %161, %58 : vector<32x128xf32>
    %cst_30 = arith.constant 1.000000e+00 : f32
    %163 = vector.broadcast %cst_30 : f32 to vector<32x128xf32>
    %164 = arith.mulf %163, %31 : vector<32x128xf32>
    %165 = arith.addf %162, %164 : vector<32x128xf32>
    %cst_31 = arith.constant 1.000000e+00 : f32
    %166 = vector.broadcast %cst_31 : f32 to vector<32x128xf32>
    %167 = arith.mulf %166, %160 : vector<32x128xf32>
    %168 = arith.subf %165, %167 : vector<32x128xf32>
    %c0_32 = arith.constant 0 : index
    %c0_33 = arith.constant 0 : index
    %169 = vector.load %arg5[%c0_32, %c0_33] : memref<32x128xf32, #tpu.memory_space<vmem>>, vector<32x128xf32>
    tpu.vector_store %arg5[%c0_32, %c0_33], %168 {strides = array<i32>} : memref<32x128xf32, #tpu.memory_space<vmem>>, vector<32x128xf32>,
    %170 = tpu.iota {dimensions = array<i32: 0>} : vector<16x128xi32>
    %171 = vector.extract_strided_slice %168 {offsets = [0, 0], sizes = [16, 128], strides = [1, 1]} : vector<32x128xf32> to vector<16x128xf32>
    %cst_34 = arith.constant dense<0x7F800000> : vector<128xf32>
    %172 = vector.multi_reduction <minimumf>, %171, %cst_34 [0] : vector<16x128xf32> to vector<128xf32>
    %173 = vector.shape_cast %172 : vector<128xf32> to vector<1x128xf32>
    %174 = vector.broadcast %173 : vector<1x128xf32> to vector<16x128xf32>
    %175 = arith.cmpf ole, %171, %174 : vector<16x128xf32>
    %c16_i32 = arith.constant 16 : i32
    %176 = vector.broadcast %c16_i32 : i32 to vector<16x128xi32>
    %177 = arith.select %175, %170, %176 : vector<16x128xi1>, vector<16x128xi32>
    %cst_35 = arith.constant dense<2147483647> : vector<128xi32>
    %178 = vector.multi_reduction <minsi>, %177, %cst_35 [0] : vector<16x128xi32> to vector<128xi32>
    %179 = vector.shape_cast %178 : vector<128xi32> to vector<1x128xi32>
    %180 = vector.extract_strided_slice %168 {offsets = [16, 0], sizes = [16, 128], strides = [1, 1]} : vector<32x128xf32> to vector<16x128xf32>
    %cst_36 = arith.constant dense<0x7F800000> : vector<128xf32>
    %181 = vector.multi_reduction <minimumf>, %180, %cst_36 [0] : vector<16x128xf32> to vector<128xf32>
    %182 = vector.shape_cast %181 : vector<128xf32> to vector<1x128xf32>
    %183 = vector.broadcast %182 : vector<1x128xf32> to vector<16x128xf32>
    %184 = arith.cmpf ole, %180, %183 : vector<16x128xf32>
    %c16_i32_37 = arith.constant 16 : i32
    %185 = vector.broadcast %c16_i32_37 : i32 to vector<16x128xi32>
    %186 = arith.select %184, %170, %185 : vector<16x128xi1>, vector<16x128xi32>
    %cst_38 = arith.constant dense<2147483647> : vector<128xi32>
    %187 = vector.multi_reduction <minsi>, %186, %cst_38 [0] : vector<16x128xi32> to vector<128xi32>
    %188 = vector.shape_cast %187 : vector<128xi32> to vector<1x128xi32>
    %189 = tpu.concatenate %179, %188 in 0 : vector<1x128xi32>, vector<1x128xi32> -> vector<2x128xi32>
    %c0_39 = arith.constant 0 : index
    %c0_40 = arith.constant 0 : index
    %190 = vector.load %arg6[%c0_39, %c0_40] : memref<2x128xi32, #tpu.memory_space<vmem>>, vector<2x128xi32>
    tpu.vector_store %arg6[%c0_39, %c0_40], %189 {strides = array<i32>} : memref<2x128xi32, #tpu.memory_space<vmem>>, vector<2x128xi32>,
    return
  }
  func.func @transform_0(%arg0: i32) -> (i32, i32) {
    %c0_i32 = arith.constant 0 : i32
    %c0_i32_0 = arith.constant 0 : i32
    %c0_i32_1 = arith.constant 0 : i32
    return %c0_i32, %c0_i32_0 : i32, i32
  }
  func.func @transform_1(%arg0: i32) -> (i32, i32) {
    %c0_i32 = arith.constant 0 : i32
    %c0_i32_0 = arith.constant 0 : i32
    %c0_i32_1 = arith.constant 0 : i32
    return %c0_i32, %c0_i32_0 : i32, i32
  }
  func.func @transform_2(%arg0: i32) -> (i32, i32) {
    %c0_i32 = arith.constant 0 : i32
    %c0_i32_0 = arith.constant 0 : i32
    return %c0_i32, %arg0 : i32, i32
  }
  func.func @transform_3(%arg0: i32) -> (i32, i32) {
    %c0_i32 = arith.constant 0 : i32
    %c0_i32_0 = arith.constant 0 : i32
    return %c0_i32, %arg0 : i32, i32
  }
  func.func @transform_4(%arg0: i32) -> (i32, i32) {
    %c0_i32 = arith.constant 0 : i32
    %c0_i32_0 = arith.constant 0 : i32
    return %c0_i32, %arg0 : i32, i32
  }
  func.func @transform_5(%arg0: i32) -> (i32, i32) {
    %c0_i32 = arith.constant 0 : i32
    %c0_i32_0 = arith.constant 0 : i32
    return %c0_i32, %arg0 : i32, i32
  }
}

</mosaic_0001>

<bundles_post_ra>
// kernel: tpu_custom_call.1
= control target key start
LH: loop header
LB: loop body
LE: loop exit
PB: predicated region body
PF: predicated region fallthrough
CT: control target
= control target key end

     0   :  { %11 = vsyncpa [#allocation3], 0  ;;  %s1741_s0 = inlined_call_operand.vmem [shape: f32[32,32], index: 0, kind: input, shape index: {}]   ;;  %s1742_s1 = inlined_call_operand.vmem [shape: f32[32,4], index: 1, kind: input, shape index: {}]   ;;  %s1743_s2 = inlined_call_operand.hbm [shape: bf16[32,128], index: 2, kind: input, shape index: {}]   ;;  %s1744_s3 = inlined_call_operand.vmem [shape: f32[4,128], index: 3, kind: input, shape index: {}]   ;;  %s1745_s4 = inlined_call_operand.hbm [shape: f32[32,128], index: 4, kind: output, shape index: {0}]   ;;  %s1746_s5 = inlined_call_operand.hbm [shape: s32[2,128], index: 5, kind: output, shape index: {1}]  }
   0x1   :  { %12 = vsyncpa [#allocation4], 0 }
   0x2   :  { %13 = vsyncpa [#allocation7], 0  ;;  %s22_s20 = sshll.u32 %s1743_s2, 4  ;;  %s1138_s21 = smov [#allocation2]   ;;  %s23_s20 = int_to_ptr.hbm [resolvable:$true] %s22_s20 }
   0x3   :  { %s24_s22 = sshll.u32 %s1138_s21, 4  ;;  %s1139_s23 = smov 64   ;;  %s25_s22 = int_to_ptr.vmem [resolvable:$true] %s24_s22 }
   0x4   :  { %s1140_s24 = smov 4  }
   0x5   :  { %30 = dma.hbm_to_vmem [thread:$0]  %s23_s20, 256, %s25_s22, [#allocation3], %s1139_s23, %s1139_s23, %s1140_s24  }
   0x6   :  { %1132 = dma.done.wait [#allocation3], 256  }
   0x7   :  { %1133 = vsyncadd [#allocation3], 4294967040  ;;  %v1141_v0 = vmov 1   ;;  %v1142_v1 = vmov 0   ;;  %v1143_v2 = vmov 3   ;;  %v1190_v3 = vld [vmem:[%s1742_s1 + $0x10] sm:$0xff] }
   0x8   :  { %997 = vset.pattern.permute.xlu2 %v1141_v0  ;;  %996 = vset.pattern.permute.xlu1 %v1142_v1  ;;  %v1195_v4 = vld [vmem:[%s1742_s1] sm:$0xff]  ;;  %v974_v5 = vld [vmem:[#allocation2 + $0x8] sm:$0xff]   ;;  %vm54_vm0 = vcmask 261120   ;;  %v1205_v8 = vld [vmem:[%s1742_s1 + $0x18] sm:$0xff]  ;;  %s1144_s11 = smov 126   ;;  %v1145_v55 = vmov 2  }
   0x9   :  { %1002 = vset.pattern.permute.xlu0 %v1143_v2  ;;  %473 = vperm.xlu1 %996, %v1190_v3   ;;  %v577_v6 = vmul.f32 0.5, %v1195_v4  ;;  %v1200_v7 = vunpack.c.h.bf16 %v974_v5  ;;  %v1207_v9 = vunpack.c.l.bf16 %v974_v5  ;;  %v967_v10 = vld [vmem:[#allocation2] sm:$0xff]   ;;  %v39_v13 = vld [vmem:[%s1741_s0 + $0x10] sm:$0xff]  ;;  %v40_v14 = vld [vmem:[%s1741_s0 + $0x18] sm:$0xff]  ;;  %v580_v26 = vmul.f32 0.5, %v1205_v8  ;;  %s1146_s16 = smov 127  }
   0xa   :  { %491 = vperm.xlu2 %997, %v1195_v4   ;;  %v1209_v11 = vunpack.c.h.bf16 %v967_v10  ;;  %v1211_v12 = vunpack.c.l.bf16 %v967_v10  ;;  %v37_v15 = vld [vmem:[%s1741_s0] sm:$0xff]  ;;  %v62_v18 = vsel %vm54_vm0, %v39_v13, 0  ;;  %v65_v19 = vsel %vm54_vm0, %v40_v14, 0  ;;  %v38_v24 = vld [vmem:[%s1741_s0 + $0x8] sm:$0xff]  ;;  %s933_s20 = sshll.u32 %s1745_s4, 4  ;;  %s1148_s21 = smov 128   ;;  %s934_s20 = int_to_ptr.hbm [resolvable:$true] %s933_s20 }
   0xb   :  { %585 = vrot.lane.b32.xlu0 %v577_v6, %s1144_s11  ;;  %975 = vmatpush.msra.mxu2 %v1200_v7  ;;  %v128_v16 = vsub.f32 %v1200_v7, %v1200_v7  ;;  %v133_v17 = vsub.f32 %v1207_v9, %v1207_v9  ;;  %v1234_v21 = vand.u32 4294901760, %v62_v18  ;;  %v1241_v23 = vand.u32 4294901760, %v65_v19  ;;  %v1252_v29 = vld [vmem:[%s1742_s1 + $0x8] sm:$0xff]  ;;  %s1149_s22 = smov 8   ;;  %s1150_s4 = smov [#allocation6]  }
   0xc   :  { %v1232_v20 = vsub.f32 %v1209_v11, %v1209_v11  ;;  %v1238_v22 = vsub.f32 %v1211_v12, %v1211_v12  ;;  %79 = vmatpush.msra.mxu0 %v1200_v7  ;;  %v56_v28 = vsel %vm54_vm0, %v37_v15, 0  ;;  %v59_v37 = vsel %vm54_vm0, %v38_v24, 0  ;;  %s945_s23 = sshll.u32 %s1150_s4, 4  ;;  %s947_s2 = sshll.u32 %s1746_s5, 4  ;;  %s946_s23 = int_to_ptr.vmem [resolvable:$true] %s945_s23  ;;  %s948_s2 = int_to_ptr.hbm [resolvable:$true] %s947_s2 }
   0xd   :  { %976 = vmatpush.msra.mxu2 %v1207_v9  ;;  %v129_v25 = vand.u32 4294901760, %v128_v16  ;;  %v134_v27 = vand.u32 4294901760, %v133_v17  ;;  %v1256_v31 = vsub.f32 %v62_v18, %v1234_v21  ;;  %v1261_v33 = vsub.f32 %v65_v19, %v1241_v23 }
   0xe   :  { %v139_v30 = vand.u32 4294901760, %v1232_v20  ;;  %v144_v32 = vand.u32 4294901760, %v1238_v22  ;;  %80 = vmatpush.msra.mxu0 %v1207_v9  ;;  %v1264_v36 = vand.u32 4294901760, %v56_v28  ;;  %v1284_v46 = vand.u32 4294901760, %v59_v37 }
   0xf   :  { %v130_v34 = vsub.f32 %v128_v16, %v129_v25  ;;  %977 = vmatpush.msra.mxu2 %v1209_v11  ;;  %v135_v35 = vsub.f32 %v133_v17, %v134_v27  ;;  %v101_v39 = vand.u32 4294901760, %v1256_v31  ;;  %v109_v45 = vand.u32 4294901760, %v1261_v33 }
  0x10   :  { %v140_v38 = vsub.f32 %v1232_v20, %v139_v30  ;;  %81 = vmatpush.msra.mxu0 %v1209_v11  ;;  %v145_v42 = vsub.f32 %v1238_v22, %v144_v32  ;;  %v1276_v43 = vsub.f32 %v56_v28, %v1264_v36  ;;  %v92_v53 = vsub.f32 %v59_v37, %v1284_v46 }
  0x11   :  { %478 = vperm.xlu1 %996, %v1205_v8   ;;  %v131_v40 = vand.u32 4294901760, %v130_v34  ;;  %v136_v41 = vand.u32 4294901760, %v135_v35  ;;  %978 = vmatpush.msra.mxu2 %v1211_v12  ;;  %v102_v44 = vsub.f32 %v1256_v31, %v101_v39  ;;  %v110_v52 = vsub.f32 %v1261_v33, %v109_v45 }
  0x12   :  { %495 = vperm.xlu2 %997, %v1252_v29   ;;  %82 = vmatpush.msra.mxu0 %v1211_v12  ;;  %v141_v47 = vand.u32 4294901760, %v140_v38  ;;  %v85_v48 = vand.u32 4294901760, %v1276_v43  ;;  %v146_v50 = vand.u32 4294901760, %v145_v42  ;;  %v93_v57 = vand.u32 4294901760, %v92_v53 }
  0x13   :  { %979 = vmatpush.msra.mxu3 %v131_v40  ;;  %591 = vrot.lane.b32.xlu0 %v580_v26, %s1144_s11  ;;  %v103_v49 = vand.u32 4294901760, %v102_v44  ;;  %v111_v56 = vand.u32 4294901760, %v110_v52  ;;  %v579_v60 = vmul.f32 0.5, %v1190_v3  ;;  %v578_v61 = vmul.f32 0.5, %v1252_v29 }
  0x14   :  { %132 = vmatpush.msra.mxu1 %v131_v40  ;;  %178 = vmatpush.msrb.mxu2 %v128_v16  ;;  %v86_v51 = vsub.f32 %v1276_v43, %v85_v48  ;;  %v94_v58 = vsub.f32 %v92_v53, %v93_v57  ;;  %v1357_v16 = vld [vmem:[%s1744_s3] sm:$0xf]  ;;  %s1147_s3 = smov [#allocation5]  }
  0x15   :  { %980 = vmatpush.msra.mxu3 %v136_v41  ;;  %261 = vmatpush.msrb.mxu0 %v129_v25  ;;  %v1363_v19 = vperm.slane %v1357_v16, 0  ;;  %s931_s17 = sshll.u32 %s1147_s3, 4  ;;  %s932_s17 = int_to_ptr.vmem [resolvable:$true] %s931_s17 }
  0x16   :  { %104 = vmatmul.f32.vlgmr.msra.gmra.mxu2 %v103_v49  ;;  %137 = vmatpush.msra.mxu1 %v136_v41  ;;  %v87_v54 = vand.u32 4294901760, %v86_v51  ;;  %v95_v59 = vand.u32 4294901760, %v94_v58 }
  0x17   :  { %981 = vmatpush.msra.mxu3 %v141_v47  ;;  %180 = vmatpush.msrb.mxu2 %v133_v17 }
  0x18   :  { %142 = vmatpush.msra.mxu1 %v141_v47  ;;  %264 = vmatpush.msrb.mxu0 %v134_v27 }
  0x19   :  { %982 = vmatpush.msra.mxu3 %v146_v50  ;;  %998 = vset.pattern.permute.xlu1 %v1141_v0 }
  0x1a   :  { %999 = vset.pattern.permute.xlu2 %v1145_v55  ;;  %503 = vperm.xlu1 %998, %v1205_v8  }
  0x1b   :  { %520 = vperm.xlu2 %999, %v1195_v4   ;;  %157 = vmatmul.f32.vlgmr.msra.gmra.mxu3 %v1234_v21 }
  0x1c   :  { %553 = vperm.xlu0 %1002, %v1252_v29   ;;  %88 = vmatmul.f32.vlgmr.msra.gmra.mxu0 %v87_v54 }
  0x1d   :  { %147 = vmatpush.msra.mxu1 %v146_v50  ;;  %218 = vmatpush.msrb.mxu3 %v1200_v7 }
  0x1e   :  { %112 = vmatmul.f32.gmra.mxu2 %v111_v56  ;;  %149 = vmatmul.f32.vlgmr.msra.gmra.mxu1 %v1264_v36 }
  0x1f   :  { %182 = vmatpush.msrb.mxu2 %v1232_v20  ;;  %219 = vmatpush.msrb.mxu3 %v1207_v9 }
  0x20   :  { %300 = vmatpush.msrb.mxu1 %v1200_v7  ;;  %267 = vmatpush.msrb.mxu0 %v139_v30 }
  0x21   :  { %184 = vmatpush.msrb.mxu2 %v1238_v22  ;;  %220 = vmatpush.msrb.mxu3 %v1209_v11 }
  0x22   :  { %1000 = vset.pattern.permute.xlu1 %v1145_v55  ;;  %301 = vmatpush.msrb.mxu1 %v1207_v9 }
  0x23   :  { %528 = vperm.xlu2 %999, %v1190_v3   ;;  %161 = vmatmul.f32.gmra.mxu3 %v1241_v23 }
  0x24   :  { %524 = vperm.xlu1 %1000, %v1252_v29   ;;  %1003 = vset.pattern.permute.xlu0 %v1141_v0 }
  0x25   :  { %499 = vperm.xlu0 %1003, %v1190_v3   ;;  %221 = vmatpush.msrb.mxu3 %v1211_v12 }
  0x26   :  { %187 = vmatmul.f32.vlgmr.msrb.gmra.mxu2 %v1276_v43  ;;  %96 = vmatmul.f32.gmra.mxu0 %v95_v59 }
  0x27   :  { %153 = vmatmul.f32.gmra.mxu1 %v1284_v46  ;;  %270 = vmatpush.msrb.mxu0 %v144_v32 }
  0x28   :  { %302 = vmatpush.msrb.mxu1 %v1209_v11 }
  0x2a   :  { %303 = vmatpush.msrb.mxu1 %v1211_v12 }
  0x2b   :  { %589 = vrot.lane.b32.xlu2 %v579_v60, %s1144_s11  ;;  %225 = vmatmul.f32.vlgmr.msrb.gmra.mxu3 %v85_v48 }
  0x2c   :  { %587 = vrot.lane.b32.xlu1 %v578_v61, %s1144_s11  ;;  %1001 = vset.pattern.permute.xlu2 %v1143_v2 }
  0x2e   :  { %192 = vmatmul.f32.gmra.mxu2 %v92_v53  ;;  %272 = vmatmul.f32.vlgmr.msrb.gmra.mxu0 %v1264_v36 }
  0x2f   :  { %305 = vmatmul.f32.vlgmr.msrb.gmra.mxu1 %v1264_v36 }
  0x33   :  { %231 = vmatmul.f32.gmra.mxu3 %v93_v57  ;;  %549 = vperm.xlu2 %1001, %v1195_v4  }
  0x34   :  { %532 = vperm.xlu1 %1000, %v1205_v8  }
  0x36   :  { %197 = vmatmul.f32.gmra.mxu2 %v1256_v31  ;;  %276 = vmatmul.f32.gmra.mxu0 %v1284_v46  ;;  %v1382_v31 = vperm.slane %v1357_v16, 2 }
  0x37   :  { %309 = vmatmul.f32.gmra.mxu1 %v1284_v46 }
  0x3b   :  { %237 = vmatmul.f32.gmra.mxu3 %v101_v39  ;;  %561 = vperm.xlu2 %1001, %v1205_v8  }
  0x3c   :  { %1004 = vset.pattern.permute.xlu1 %v1143_v2 }
  0x3d   :  { %557 = vperm.xlu1 %1004, %v1190_v3  }
  0x3e   :  { %202 = vmatmul.f32.gmra.mxu2 %v1261_v33  ;;  %280 = vmatmul.f32.gmra.mxu0 %v1234_v21 }
  0x3f   :  { %313 = vmatmul.f32.gmra.mxu1 %v1234_v21 }
  0x43   :  { %243 = vmatmul.f32.gmra.mxu3 %v109_v45  ;;  %1005 = vset.pattern.permute.xlu2 %v1142_v1 }
  0x45   :  { %1006 = vset.pattern.permute.xlu1 %v1142_v1 }
  0x46   :  { %284 = vmatmul.f32.gmra.mxu0 %v1241_v23 }
  0x47   :  { %317 = vmatmul.f32.gmra.mxu1 %v1241_v23 }
  0x64   :  { %v1344_v62 = vpop.permute.xlu2 %491 }
  0x6c   :  { %v1346_v63 = vpop.permute.xlu2 %495 }
  0x75   :  { %v1348_v2 = vpop.permute.xlu2 %520 }
  0x7b   :  { %v474_v5 = vpop.permute.xlu1 %473 }
  0x7c   :  { %v484_v32 = vsub.f32 %v474_v5, %v1363_v19 }
  0x7d   :  { %v529_v6 = vpop.permute.xlu2 %528  ;;  %v586_v7 = vpop.permute.xlu0 %585 }
  0x7e   :  { %v601_v9 = vadd.f32 %v586_v7, %v1195_v4  ;;  %v597_v17 = vsub.f32 %v1195_v4, %v586_v7  ;;  %v538_v35 = vsub.f32 %v529_v6, %v1382_v31 }
  0x80   :  { %642 = vperm.xlu2 %1005, %v601_v9   ;;  %v1371_v22 = vsub.f32 %v601_v9, %v597_v17  ;;  %v542_v38 = vand.u32 2147483647, %v538_v35 }
  0x83   :  { %v479_v10 = vpop.permute.xlu1 %478 }
  0x84   :  { %v485_v20 = vsub.f32 %v479_v10, %v1363_v19 }
  0x85   :  { %v590_v11 = vpop.permute.xlu2 %589  ;;  %v592_v12 = vpop.permute.xlu0 %591 }
  0x86   :  { %v599_v13 = vsub.f32 %v1190_v3, %v590_v11  ;;  %v603_v14 = vadd.f32 %v590_v11, %v1190_v3  ;;  %v604_v15 = vadd.f32 %v592_v12, %v1205_v8  ;;  %v1368_v3 = vperm.slane %v1357_v16, 1 }
  0x87   :  { %v489_v25 = vand.u32 2147483647, %v485_v20  ;;  %v600_v27 = vsub.f32 %v1205_v8, %v592_v12  ;;  %v488_v8 = vand.u32 2147483647, %v484_v32 }
  0x88   :  { %652 = vperm.xlu1 %1006, %v603_v14   ;;  %v1360_v18 = vsub.f32 %v603_v14, %v599_v13  ;;  %657 = vperm.xlu2 %1005, %v604_v15  }
  0x89   :  { %v1379_v30 = vsub.f32 %v604_v15, %v600_v27 }
  0x8a   :  { %623 = vrot.lane.b32.xlu0 %v1360_v18, %s1146_s16 }
  0x8c   :  { %v504_v21 = vpop.permute.xlu1 %503 }
  0x8d   :  { %v510_v23 = vsub.f32 %v504_v21, %v1368_v3  ;;  %v1406_v51 = vpop.permute.xlu2 %549 }
  0x8e   :  { %v1374_v24 = vpop.permute.xlu0 %553 }
  0x8f   :  { %v514_v26 = vand.u32 2147483647, %v510_v23 }
  0x90   :  { %619 = vrot.lane.b32.xlu1 %v1371_v22, %s1146_s16 }
  0x91   :  { %v518_v28 = vadd.f32 %v514_v26, %v489_v25 }
  0x95   :  { %v1408_v54 = vpop.permute.xlu2 %561 }
  0x96   :  { %v1385_v33 = vpop.permute.xlu1 %524 }
  0x97   :  { %v500_v34 = vpop.permute.xlu0 %499 }
  0x98   :  { %v509_v36 = vsub.f32 %v500_v34, %v1368_v3  ;;  %625 = vrot.lane.b32.xlu1 %v1379_v30, %s1146_s16 }
  0x99   :  { %v105_v49 = vpop.f32.mrf.mxu2 }
  0x9a   :  { %v513_v37 = vand.u32 2147483647, %v509_v36 }
  0x9c   :  { %v517_v39 = vadd.f32 %v513_v37, %v488_v8 }
  0x9e   :  { %v588_v40 = vpop.permute.xlu1 %587  ;;  %v1391_v41 = vadd.f32 %v542_v38, %v517_v39  ;;  %v158_v50 = vpop.f32.mrf.mxu3 }
  0x9f   :  { %v598_v42 = vsub.f32 %v1252_v29, %v588_v40  ;;  %v602_v43 = vadd.f32 %v588_v40, %v1252_v29  ;;  %v159_v8 = vadd.f32 %v158_v50, %v105_v49 }
  0xa0   :  { %667 = vperm.xlu1 %1006, %v597_v17  }
  0xa1   :  { %703 = vperm.xlu0 %1003, %v602_v43   ;;  %v612_v44 = vsub.f32 %v602_v43, %v598_v42  ;;  %v113_v52 = vpop.f32.mrf.mxu2 }
  0xa3   :  { %621 = vrot.lane.b32.xlu2 %v612_v44, %s1146_s16 }
  0xa6   :  { %v533_v45 = vpop.permute.xlu1 %532  ;;  %v162_v53 = vpop.f32.mrf.mxu3 }
  0xa7   :  { %v539_v46 = vsub.f32 %v533_v45, %v1382_v31  ;;  %v163_v21 = vadd.f32 %v162_v53, %v113_v52 }
  0xa8   :  { %682 = vperm.xlu1 %1006, %v600_v27  }
  0xa9   :  { %v543_v47 = vand.u32 2147483647, %v539_v46  ;;  %728 = vperm.xlu0 %1003, %v599_v13   ;;  %v188_v55 = vpop.f32.mrf.mxu2 }
  0xab   :  { %v1397_v48 = vadd.f32 %v543_v47, %v518_v28  ;;  %672 = vperm.xlu2 %1005, %v598_v42  }
  0xae   :  { %v226_v57 = vpop.f32.mrf.mxu3 }
  0xb0   :  { %1008 = vset.pattern.permute.xlu1 %v1141_v0 }
  0xb1   :  { %1009 = vset.pattern.permute.xlu0 %v1142_v1  ;;  %707 = vperm.xlu1 %1008, %v603_v14   ;;  %v193_v60 = vpop.f32.mrf.mxu2 }
  0xb2   :  { %463 = vperm.xlu0 %1009, %v1195_v4   ;;  %v89_v4 = vpop.f32.mrf.mxu0 }
  0xb3   :  { %1007 = vset.pattern.permute.xlu2 %v1141_v0  ;;  %v150_v0 = vpop.f32.mrf.mxu1 }
  0xb4   :  { %699 = vperm.xlu2 %1007, %v601_v9   ;;  %v151_v34 = vadd.f32 %v150_v0, %v89_v4 }
  0xb6   :  { %v232_v5 = vpop.f32.mrf.mxu3  ;;  %v189_v38 = vadd.f32 %v188_v55, %v151_v34  ;;  %v537_v34 = vsub.f32 %v1385_v33, %v1382_v31 }
  0xb9   :  { %720 = vperm.xlu1 %1008, %v597_v17   ;;  %v198_v9 = vpop.f32.mrf.mxu2 }
  0xba   :  { %468 = vperm.xlu0 %1009, %v1252_v29   ;;  %v97_v29 = vpop.f32.mrf.mxu0  ;;  %v199_v40 = vadd.f32 %v198_v9, %v159_v8 }
  0xbb   :  { %v154_v56 = vpop.f32.mrf.mxu1 }
  0xbc   :  { %711 = vperm.xlu2 %1007, %v604_v15   ;;  %v155_v46 = vadd.f32 %v154_v56, %v97_v29 }
  0xbe   :  { %v194_v53 = vadd.f32 %v193_v60, %v155_v46  ;;  %v536_v60 = vsub.f32 %v1348_v2, %v1382_v31  ;;  %v508_v2 = vsub.f32 %v1346_v63, %v1368_v3 }
  0xc0   :  { %v233_v55 = vadd.f32 %v232_v5, %v194_v53  ;;  %v512_v8 = vand.u32 2147483647, %v508_v2 }
  0xc1   :  { %732 = vperm.xlu1 %1008, %v600_v27   ;;  %v203_v25 = vpop.f32.mrf.mxu2 }
  0xc2   :  { %647 = vperm.xlu0 %1009, %v602_v43   ;;  %v273_v59 = vpop.f32.mrf.mxu0  ;;  %v204_v28 = vadd.f32 %v203_v25, %v163_v21  ;;  %v227_v43 = vadd.f32 %v226_v57, %v189_v38 }
  0xc3   :  { %v306_v61 = vpop.f32.mrf.mxu1 }
  0xc4   :  { %724 = vperm.xlu2 %1007, %v598_v42   ;;  %v274_v47 = vadd.f32 %v273_v59, %v227_v43 }
  0xc6   :  { %v307_v0 = vadd.f32 %v306_v61, %v274_v47  ;;  %v1432_v61 = vperm.slane %v1357_v16, 3 }
  0xc8   :  { %v566_v63 = vsub.f32 %v1374_v24, %v1432_v61 }
  0xc9   :  { %1011 = vset.pattern.permute.xlu1 %v1142_v1 }
  0xca   :  { %677 = vperm.xlu0 %1009, %v599_v13   ;;  %v277_v7 = vpop.f32.mrf.mxu0  ;;  %v238_v13 = vpop.f32.mrf.mxu3  ;;  %v570_v31 = vand.u32 2147483647, %v566_v63 }
  0xcb   :  { %v310_v11 = vpop.f32.mrf.mxu1  ;;  %v239_v45 = vadd.f32 %v238_v13, %v199_v40  ;;  %v278_v57 = vadd.f32 %v277_v7, %v233_v55  ;;  %v507_v13 = vsub.f32 %v1344_v62, %v1368_v3  ;;  %v565_v7 = vsub.f32 %v1406_v51, %v1432_v61 }
  0xcc   :  { %1010 = vset.pattern.permute.xlu2 %v1142_v1  ;;  %v1412_v1 = vpop.permute.xlu1 %557 }
  0xcd   :  { %v311_v56 = vadd.f32 %v310_v11, %v278_v57  ;;  %v540_v11 = vand.u32 2147483647, %v536_v60  ;;  %v569_v25 = vand.u32 2147483647, %v565_v7 }
  0xd2   :  { %v281_v20 = vpop.f32.mrf.mxu0  ;;  %v244_v32 = vpop.f32.mrf.mxu3 }
  0xd3   :  { %v314_v27 = vpop.f32.mrf.mxu1  ;;  %v245_v35 = vadd.f32 %v244_v32, %v204_v28  ;;  %v282_v4 = vadd.f32 %v281_v20, %v239_v45 }
  0xd5   :  { %v315_v49 = vadd.f32 %v314_v27, %v282_v4 }
  0xda   :  { %v1410_v58 = vpop.permute.xlu2 %642  ;;  %v285_v37 = vpop.f32.mrf.mxu0 }
  0xdb   :  { %v286_v39 = vadd.f32 %v285_v37, %v245_v35  ;;  %v318_v42 = vpop.f32.mrf.mxu1 }
  0xe2   :  { %v1414_v6 = vpop.permute.xlu2 %657 }
  0xfa   :  { %v1416_v10 = vpop.permute.xlu1 %652 }
  0xfc   :  { %v624_v12 = vpop.permute.xlu0 %623 }
  0xfd   :  { %v633_v14 = vmul.f32 %v624_v12, %v1360_v18  ;;  %v622_v15 = vpop.permute.xlu2 %621  ;;  %v964_v12 = vmul.f32 -1.442695, %v315_v49 }
  0xfe   :  { %v632_v17 = vmul.f32 %v622_v15, %v612_v44  ;;  %v319_v44 = vadd.f32 %v318_v42, %v286_v39  ;;  %v511_v15 = vand.u32 2147483647, %v507_v13 }
  0xff   :  { %764 = vperm.xlu1 %1011, %v633_v14  }
 0x100   :  { %759 = vperm.xlu0 %1009, %v632_v17   ;;  %v965_v52 = vmul.f32 -1.442695, %v319_v44  ;;  %v963_v17 = vmul.f32 -1.442695, %v311_v56 }
 0x102   :  { %v620_v23 = vpop.permute.xlu1 %619  ;;  %1012 = vpow2.f32 %v965_v52 }
 0x103   :  { %v631_v26 = vmul.f32 %v620_v23, %v1371_v22 }
 0x105   :  { %754 = vperm.xlu2 %1010, %v631_v26   ;;  %v1464_v52 = vpop.permute.xlu2 %672 }
 0x108   :  { %v1013_v9 = vpop.eup %1012 }
 0x109   :  { %v1427_v29 = vadd.f32 1.0, %v1013_v9 }
 0x10a   :  { %v626_v36 = vpop.permute.xlu1 %625 }
 0x10b   :  { %v634_v18 = vmul.f32 %v626_v36, %v1379_v30  ;;  %v962_v30 = vmul.f32 -1.442695, %v307_v0  ;;  %vm387_vm1 = vweird.f32 %v1427_v29  ;;  %v393_v0 = vand.u32 2147483648, %v1427_v29 }
 0x10c   :  { %v391_v49 = vand.u32 2147483647, %v1427_v29 }
 0x10d   :  { %769 = vperm.xlu2 %1010, %v634_v18   ;;  %1014 = vpow2.f32 %v962_v30  ;;  %v541_v18 = vand.u32 2147483647, %v537_v34  ;;  %v394_v9 = vor.u32 1.1754944e-38, %v393_v0 }
 0x10e   :  { %1016 = vpow2.f32 %v964_v12  ;;  %vm392_vm4 = vcmp.eq.f32.partialorder %v391_v49, 8.507059e+37 }
 0x10f   :  { %1018 = vrcp.f32 %v1427_v29 }
 0x110   :  { %1020 = vpow2.f32 %v963_v17 }
 0x112   :  { %v1442_v26 = vpop.permute.xlu1 %667 }
 0x113   :  { %v1421_v22 = vpop.permute.xlu0 %703  ;;  %v1015_v14 = vpop.eup %1014 }
 0x114   :  { %v1017_v20 = vpop.eup %1016  ;;  %v1438_v21 = vadd.f32 1.0, %v1015_v14  ;;  %v605_v14 = vmul.f32 0.5, %v1357_v16 }
 0x115   :  { %v1444_v28 = vadd.f32 1.0, %v1017_v20  ;;  %v1019_v32 = vpop.eup %1018 }
 0x116   :  { %1022 = vrcp.f32 %v1438_v21  ;;  %v383_v37 = vmul.f32 %v1019_v32, %v1427_v29  ;;  %v1021_v39 = vpop.eup %1020  ;;  %vm388_vm2 = vweird.f32 %v1019_v32  ;;  %vm342_vm5 = vweird.f32 %v1438_v21 }
 0x117   :  { %1024 = vrcp.f32 %v1444_v28  ;;  %v1461_v24 = vadd.f32 1.0, %v1021_v39  ;;  %vm1470_vm3 = vmor %vm387_vm1, %vm388_vm2  ;;  %v346_v60 = vand.u32 2147483647, %v1438_v21  ;;  %vm372_vm7 = vweird.f32 %v1444_v28 }
 0x118   :  { %v384_v42 = vsub.f32 1.0, %v383_v37  ;;  %v378_v20 = vand.u32 2147483648, %v1444_v28 }
 0x119   :  { %1026 = vrcp.f32 %v1461_v24  ;;  %vm347_vm11 = vcmp.eq.f32.partialorder %v346_v60, 8.507059e+37  ;;  %vm357_vm13 = vweird.f32 %v1461_v24 }
 0x11a   :  { %v1456_v43 = vpop.permute.xlu1 %682  ;;  %v385_v46 = vmul.f32 %v1019_v32, %v384_v42 }
 0x11b   :  { %v1423_v50 = vpop.permute.xlu0 %728 }
 0x11c   :  { %v1023_v40 = vpop.eup %1022  ;;  %v386_v53 = vadd.f32 %v1019_v32, %v385_v46 }
 0x11d   :  { %v338_v45 = vmul.f32 %v1023_v40, %v1438_v21  ;;  %vm343_vm6 = vweird.f32 %v1023_v40 }
 0x11e   :  { %v390_v56 = vsel %vm1470_vm3, %v1019_v32, %v386_v53  ;;  %vm1491_vm9 = vmor %vm342_vm5, %vm343_vm6 }
 0x11f   :  { %v339_v4 = vsub.f32 1.0, %v338_v45  ;;  %v1487_v7 = vsel %vm392_vm4, %v394_v9, %v390_v56 }
 0x121   :  { %v340_v12 = vmul.f32 %v1023_v40, %v339_v4 }
 0x123   :  { %v1474_v57 = vpop.permute.xlu1 %707  ;;  %v341_v29 = vadd.f32 %v1023_v40, %v340_v12 }
 0x124   :  { %v464_v59 = vpop.permute.xlu0 %463 }
 0x125   :  { %v482_v5 = vsub.f32 %v464_v59, %v1363_v19  ;;  %v345_v32 = vsel %vm1491_vm9, %v1023_v40, %v341_v29  ;;  %v361_v40 = vand.u32 2147483647, %v1461_v24 }
 0x127   :  { %v486_v62 = vand.u32 2147483647, %v482_v5  ;;  %v348_v5 = vand.u32 2147483648, %v1438_v21  ;;  %v376_v21 = vand.u32 2147483647, %v1444_v28  ;;  %vm1553_vm0 = vcmp.eq.f32.partialorder %v361_v40, 8.507059e+37 }
 0x129   :  { %v515_v23 = vadd.f32 %v511_v15, %v486_v62  ;;  %v1489_v62 = vpop.permute.xlu2 %699  ;;  %vm377_vm12 = vcmp.eq.f32.partialorder %v376_v21, 8.507059e+37 }
 0x12b   :  { %v544_v27 = vadd.f32 %v540_v11, %v515_v23  ;;  %v349_v23 = vor.u32 1.1754944e-38, %v348_v5  ;;  %v721_v63 = vpop.permute.xlu1 %720 }
 0x12c   :  { %v469_v51 = vpop.permute.xlu0 %468 }
 0x12d   :  { %v1449_v35 = vadd.f32 %v569_v25, %v544_v27  ;;  %v483_v36 = vsub.f32 %v469_v51, %v1363_v19  ;;  %v1025_v19 = vpop.eup %1024  ;;  %v400_v25 = vsub.f32 1.0, %v1487_v7  ;;  %v607_v27 = vrot.slane %v605_v14, 2 }
 0x12e   :  { %v368_v47 = vmul.f32 %v1025_v19, %v1444_v28  ;;  %v1476_v13 = vpop.eup %1026  ;;  %vm373_vm8 = vweird.f32 %v1025_v19  ;;  %v568_v51 = vsub.f32 %v1408_v54, %v1432_v61 }
 0x12f   :  { %v487_v3 = vand.u32 2147483647, %v483_v36  ;;  %v353_v15 = vmul.f32 %v1476_v13, %v1461_v24  ;;  %vm1497_vm10 = vmor %vm372_vm7, %vm373_vm8  ;;  %v379_v36 = vor.u32 1.1754944e-38, %v378_v20  ;;  %v609_v37 = vsub.f32 %v1357_v16, %v607_v27 }
 0x130   :  { %v369_v30 = vsub.f32 1.0, %v368_v47  ;;  %v412_v54 = vadd.f32 1e-08, %v400_v25  ;;  %vm358_vm14 = vweird.f32 %v1476_v13 }
 0x131   :  { %v516_v38 = vadd.f32 %v512_v8, %v487_v3  ;;  %v354_v34 = vsub.f32 1.0, %v353_v15  ;;  %v440_v8 = vadd.f32 1e-08, %v1487_v7  ;;  %v610_v3 = vadd.f32 %v607_v27, %v1357_v16  ;;  %vm1540_vm15 = vmor %vm357_vm13, %vm358_vm14 }
 0x132   :  { %v370_v59 = vmul.f32 %v1025_v19, %v369_v30  ;;  %v1520_v42 = vperm.slane %v609_v37, 1  ;;  %v363_v16 = vand.u32 2147483648, %v1461_v24  ;;  %v1531_v47 = vperm.slane %v609_v37, 0 }
 0x133   :  { %v545_v33 = vadd.f32 %v541_v18, %v516_v38  ;;  %v1511_v18 = vsel %vm347_vm11, %v349_v23, %v345_v32  ;;  %v572_v38 = vand.u32 2147483647, %v568_v51  ;;  %v355_v39 = vmul.f32 %v1476_v13, %v354_v34  ;;  %v733_v20 = vpop.permute.xlu1 %732 }
 0x134   :  { %v371_v11 = vadd.f32 %v1025_v19, %v370_v59  ;;  %v1527_v45 = vsub.f32 1.0, %v1511_v18  ;;  %1028 = vlog2.f32 %v440_v8  ;;  %v1529_v46 = vperm.slane %v610_v3, 0 }
 0x135   :  { %v1458_v44 = vadd.f32 %v570_v31, %v545_v33  ;;  %v1518_v33 = vperm.slane %v610_v3, 1  ;;  %v821_v4 = vmin.f32 %v721_v63, %v1520_v42  ;;  %1030 = vlog2.f32 %v412_v54 }
 0x136   :  { %v375_v28 = vsel %vm1497_vm10, %v1025_v19, %v371_v11  ;;  %v1524_v19 = vpop.permute.xlu2 %711  ;;  %v356_v0 = vadd.f32 %v1476_v13, %v355_v39  ;;  %v805_v12 = vmin.f32 %v1442_v26, %v1531_v47  ;;  %v635_v9 = vsub.f32 %v610_v3, %v609_v37  ;;  %v1565_v11 = vpop.permute.xlu0 %647 }
 0x137   :  { %v1516_v31 = vsel %vm377_vm12, %v379_v36, %v375_v28  ;;  %v817_v55 = vmax.f32 %v1489_v62, %v1518_v33  ;;  %v1550_v56 = vadd.f32 %v572_v38, %v1397_v48  ;;  %v409_v59 = vadd.f32 1e-08, %v1527_v45 }
 0x138   :  { %v1536_v53 = vsub.f32 1.0, %v1516_v31  ;;  %v439_v30 = vadd.f32 1e-08, %v1516_v31  ;;  %v364_v29 = vor.u32 1.1754944e-38, %v363_v16  ;;  %v801_v60 = vmax.f32 %v1410_v58, %v1529_v46 }
 0x139   :  { %v825_v5 = vsub.f32 %v817_v55, %v821_v4  ;;  %v360_v15 = vsel %vm1540_vm15, %v1476_v13, %v356_v0  ;;  %v661_v48 = vmin.f32 %v1410_v58, %v1529_v46  ;;  %v437_v17 = vadd.f32 1e-08, %v1511_v18 }
 0x13a   :  { %v1029_v14 = vpop.eup %1028  ;;  %v411_v21 = vadd.f32 1e-08, %v1536_v53  ;;  %v809_v2 = vsub.f32 %v801_v60, %v805_v12  ;;  %v736_v27 = vmax.f32 %v721_v63, %v1520_v42  ;;  %v637_v51 = vrot.slane %v635_v9, 1 }
 0x13b   :  { %v1031_v23 = vpop.eup %1030  ;;  %1032 = vlog2.f32 %v439_v30  ;;  %v664_v32 = vmin.f32 %v1414_v6, %v1529_v46  ;;  %v404_v58 = vmul.f32 %v1487_v7, %v1487_v7  ;;  %v432_v13 = vmul.f32 %v400_v25, %v400_v25 }
 0x13c   :  { %1034 = vlog2.f32 %v409_v59  ;;  %v715_v34 = vmin.f32 %v1489_v62, %v1518_v33  ;;  %v686_v36 = vmax.f32 %v1442_v26, %v1531_v47  ;;  %v829_v28 = vmax.f32 %v825_v5, 0.0 }
 0x13d   :  { %v824_v8 = vmin.f32 %v733_v20, %v1520_v42  ;;  %v808_v63 = vmin.f32 %v1456_v43, %v1531_v47  ;;  %1036 = vlog2.f32 %v437_v17  ;;  %v1582_v37 = vmul.f32 0.6931472, %v1031_v23 }
 0x13e   :  { %v1580_v3 = vpop.permute.xlu2 %724  ;;  %v1584_v54 = vmul.f32 0.6931472, %v1029_v14  ;;  %v813_v7 = vmax.f32 %v809_v2, 0.0  ;;  %v820_v62 = vmax.f32 %v1524_v19, %v1518_v33  ;;  %v740_v25 = vsub.f32 %v715_v34, %v736_v27  ;;  %v678_v23 = vpop.permute.xlu0 %677 }
 0x13f   :  { %v639_v38 = vmul.f32 %v637_v51, %v635_v9  ;;  %v804_v26 = vmax.f32 %v1414_v6, %v1529_v46  ;;  %v1590_v39 = vmul.f32 0.75, %v404_v58  ;;  %v1592_v40 = vmul.f32 0.25, %v432_v13 }
 0x140   :  { %1038 = vlog2.f32 %v411_v21  ;;  %v690_v4 = vsub.f32 %v661_v48, %v686_v36  ;;  %v1596_v0 = vmul.f32 %v829_v28, %v813_v7  ;;  %v1600_v49 = vsel %vm1553_vm0, %v364_v29, %v360_v15 }
 0x141   :  { %v1594_v16 = vpop.eup %1032  ;;  %v828_v30 = vsub.f32 %v820_v62, %v824_v8  ;;  %v663_v12 = vmin.f32 %v1416_v10, %v1529_v46  ;;  %v812_v6 = vsub.f32 %v804_v26, %v808_v63  ;;  %v424_v9 = vsub.f32 0.0, %v1582_v37 }
 0x142   :  { %v1035_v55 = vpop.eup %1034  ;;  %v452_v59 = vsub.f32 0.0, %v1584_v54  ;;  %v803_v60 = vmax.f32 %v1416_v10, %v1529_v46  ;;  %v744_v5 = vmax.f32 %v740_v25, 0.0  ;;  %v739_v14 = vmax.f32 %v733_v20, %v1520_v42 }
 0x143   :  { %v1609_v48 = vperm.slane %v639_v38, 0  ;;  %v1037_v24 = vpop.eup %1036  ;;  %v687_v29 = vmax.f32 %v1464_v52, %v1531_v47  ;;  %v806_v15 = vmin.f32 %v1464_v52, %v1531_v47  ;;  %v689_v17 = vmax.f32 %v1456_v43, %v1531_v47 }
 0x144   :  { %v1618_v21 = vsub.f32 1.0, %v1600_v49  ;;  %v694_v2 = vmax.f32 %v690_v4, 0.0  ;;  %v718_v20 = vmin.f32 %v1524_v19, %v1518_v33  ;;  %1040 = vrcp.f32 %v1596_v0 }
 0x145   :  { %v832_v27 = vmax.f32 %v828_v30, 0.0  ;;  %v816_v58 = vmax.f32 %v812_v6, 0.0  ;;  %v401_v52 = vmul.f32 %v1511_v18, %v1511_v18  ;;  %v414_v13 = vmul.f32 0.6931472, %v1035_v55 }
 0x146   :  { %v1623_v51 = vpop.eup %1038  ;;  %v429_v43 = vmul.f32 %v1527_v45, %v1527_v45  ;;  %v743_v36 = vsub.f32 %v718_v20, %v739_v14  ;;  %v807_v28 = vmin.f32 %v678_v23, %v1531_v47  ;;  %v1630_v8 = vmul.f32 %v744_v5, %v694_v2 }
 0x147   :  { %v693_v63 = vsub.f32 %v664_v32, %v689_v17  ;;  %v442_v7 = vmul.f32 0.6931472, %v1037_v24  ;;  %v410_v62 = vadd.f32 1e-08, %v1618_v21  ;;  %v802_v25 = vmax.f32 %v1565_v11, %v1529_v46 }
 0x148   :  { %v819_v18 = vmax.f32 %v1474_v57, %v1518_v33  ;;  %v438_v45 = vadd.f32 1e-08, %v1600_v49  ;;  %v1639_v38 = vmul.f32 %v832_v27, %v816_v58  ;;  %v822_v4 = vmin.f32 %v1580_v3, %v1520_v42 }
 0x149   :  { %v405_v32 = vmul.f32 0.75, %v401_v52  ;;  %v421_v30 = vsub.f32 0.0, %v414_v13  ;;  %v433_v55 = vmul.f32 0.25, %v429_v43  ;;  %v823_v5 = vmin.f32 %v1423_v50, %v1520_v42 }
 0x14a   :  { %v1041_v6 = vpop.eup %1040  ;;  %v747_v14 = vmax.f32 %v743_v36, 0.0  ;;  %v811_v24 = vsub.f32 %v803_v60, %v807_v28  ;;  %v818_v17 = vmax.f32 %v1421_v22, %v1518_v33  ;;  %v697_v2 = vmax.f32 %v693_v63, 0.0 }
 0x14b   :  { %v449_v20 = vsub.f32 0.0, %v442_v7  ;;  %v810_v27 = vsub.f32 %v802_v25, %v806_v15  ;;  %v827_v58 = vsub.f32 %v819_v18, %v823_v5  ;;  %v662_v52 = vmin.f32 %v1565_v11, %v1529_v46 }
 0x14c   :  { %v688_v13 = vmax.f32 %v678_v23, %v1531_v47  ;;  %v737_v43 = vmax.f32 %v1580_v3, %v1520_v42  ;;  %v826_v60 = vsub.f32 %v818_v17, %v822_v4  ;;  %v845_v36 = vmul.f32 %v1041_v6, %v1596_v0 }
 0x14d   :  { %v815_v15 = vmax.f32 %v811_v24, 0.0  ;;  %v1660_v63 = vmul.f32 %v747_v14, %v697_v2  ;;  %v716_v11 = vmin.f32 %v1421_v22, %v1518_v33  ;;  %v738_v47 = vmax.f32 %v1423_v50, %v1520_v42 }
 0x14e   :  { %v453_v3 = vmul.f32 %v449_v20, %v433_v55  ;;  %v814_v23 = vmax.f32 %v810_v27, 0.0  ;;  %v831_v18 = vmax.f32 %v827_v58, 0.0  ;;  %v691_v4 = vsub.f32 %v662_v52, %v687_v29 }
 0x14f   :  { %v849_v5 = vsub.f32 2.0, %v845_v36  ;;  %v741_v14 = vsub.f32 %v716_v11, %v737_v43  ;;  %v431_v27 = vmul.f32 %v1536_v53, %v1536_v53  ;;  %v402_v37 = vmul.f32 %v1600_v49, %v1600_v49 }
 0x150   :  { %v1674_v42 = vmul.f32 %v831_v18, %v815_v15  ;;  %v695_v55 = vmax.f32 %v691_v4, 0.0  ;;  %vm924_vm12 = vcmask 1040384  }
 0x151   :  { %v853_v20 = vmul.f32 %v1041_v6, %v849_v5  ;;  %v428_v6 = vmul.f32 %v424_v9, %v1590_v39  ;;  %v418_v39 = vmul.f32 0.6931472, %v1623_v51 }
 0x15f   :  { %v755_v34 = vpop.permute.xlu2 %754 }
 0x160   :  { %v773_v19 = vadd.f32 %v1609_v48, %v755_v34  ;;  %v425_v34 = vmul.f32 %v421_v30, %v405_v32  ;;  %v830_v30 = vmax.f32 %v826_v60, 0.0 }
 0x162   :  { %v1642_v26 = vsub.f32 %v773_v19, %v1630_v8  ;;  %v717_v19 = vmin.f32 %v1474_v57, %v1518_v33  ;;  %v692_v57 = vsub.f32 %v663_v12, %v688_v13  ;;  %v1677_v29 = vmul.f32 %v830_v30, %v814_v23 }
 0x163   :  { %v457_v12 = vsub.f32 %v453_v3, %v425_v34  ;;  %v435_v30 = vmul.f32 0.25, %v431_v27 }
 0x164   :  { %1042 = vrcp.f32 %v1642_v26  ;;  %v742_v50 = vsub.f32 %v717_v19, %v738_v47  ;;  %v837_v46 = vsub.f32 %v1596_v0, %v1642_v26  ;;  %v696_v24 = vmax.f32 %v692_v57, 0.0 }
 0x165   :  { %1044 = vrcp.f32 %v1639_v38  ;;  %v456_v0 = vmul.f32 %v452_v59, %v1592_v40  ;;  %v865_v43 = vadd.f32 %v1449_v35, %v457_v12  ;;  %v446_v35 = vmul.f32 0.6931472, %v1594_v16 }
 0x166   :  { %1046 = vlog2.f32 %v410_v62  ;;  %v403_v62 = vmul.f32 %v1516_v31, %v1516_v31  ;;  %v746_v58 = vmax.f32 %v742_v50, 0.0  ;;  %v857_v52 = vmul.f32 %v853_v20, %v837_v46 }
 0x167   :  { %v770_v28 = vpop.permute.xlu2 %769  ;;  %v460_v16 = vsub.f32 %v456_v0, %v428_v6  ;;  %v423_v57 = vsub.f32 0.0, %v418_v39  ;;  %v567_v12 = vsub.f32 %v1412_v1, %v1432_v61 }
 0x168   :  { %v776_v7 = vadd.f32 %v1609_v48, %v770_v28  ;;  %v1696_v60 = vmul.f32 %v746_v58, %v696_v24  ;;  %v407_v4 = vmul.f32 0.75, %v403_v62 }
 0x16a   :  { %v1043_v25 = vpop.eup %1042  ;;  %v1671_v32 = vsub.f32 %v776_v7, %v1660_v63  ;;  %v427_v62 = vmul.f32 %v423_v57, %v407_v4 }
 0x16b   :  { %v785_v22 = vmul.f32 %v1043_v25, %v1642_v26  ;;  %v1045_v33 = vpop.eup %1044 }
 0x16c   :  { %1048 = vrcp.f32 %v1671_v32  ;;  %v848_v17 = vmul.f32 %v1045_v33, %v1639_v38  ;;  %v1047_v26 = vpop.eup %1046  ;;  %v840_v11 = vsub.f32 %v1639_v38, %v1671_v32  ;;  %v451_v38 = vsub.f32 0.0, %v446_v35 }
 0x16d   :  { %1050 = vlog2.f32 %v438_v45  ;;  %v789_v10 = vsub.f32 2.0, %v785_v22  ;;  %v745_v45 = vmax.f32 %v741_v14, 0.0  ;;  %v416_v23 = vmul.f32 0.6931472, %v1047_v26 }
 0x16e   :  { %1052 = vrcp.f32 %v1674_v42  ;;  %v852_v36 = vsub.f32 2.0, %v848_v17  ;;  %v455_v27 = vmul.f32 %v451_v38, %v435_v30 }
 0x16f   :  { %v793_v2 = vmul.f32 %v1043_v25, %v789_v10  ;;  %1054 = vrcp.f32 %v1677_v29  ;;  %v1699_v54 = vmul.f32 %v745_v45, %v695_v55  ;;  %v868_v55 = vadd.f32 %v1550_v56, %v460_v16 }
 0x170   :  { %v856_v18 = vmul.f32 %v1045_v33, %v852_v36  ;;  %v459_v6 = vsub.f32 %v455_v27, %v427_v62 }
 0x171   :  { %v797_v31 = vmul.f32 %v793_v2, %v1630_v8  ;;  %v765_v13 = vpop.permute.xlu1 %764 }
 0x172   :  { %v1049_v53 = vpop.eup %1048  ;;  %v775_v34 = vadd.f32 %v1609_v48, %v765_v13  ;;  %v760_v40 = vpop.permute.xlu0 %759  ;;  %v860_v14 = vmul.f32 %v856_v18, %v840_v11  ;;  %v877_v11 = vlaneseq }
 0x173   :  { %v1051_v59 = vpop.eup %1050  ;;  %v861_v28 = vsub.f32 %v797_v31, %v857_v52  ;;  %v788_v8 = vmul.f32 %v1049_v53, %v1671_v32  ;;  %v774_v19 = vadd.f32 %v1609_v48, %v760_v40  ;;  %v430_v48 = vmul.f32 %v1618_v21, %v1618_v21 }
 0x174   :  { %v779_v9 = vsub.f32 %v775_v34, %v1696_v60  ;;  %v1053_v3 = vpop.eup %1052  ;;  %v444_v49 = vmul.f32 0.6931472, %v1051_v59  ;;  %v406_v32 = vmul.f32 0.75, %v402_v37  ;;  %v422_v21 = vsub.f32 0.0, %v416_v23 }
 0x175   :  { %v1708_v15 = vsub.f32 %v865_v43, %v861_v28  ;;  %v792_v7 = vsub.f32 2.0, %v788_v8  ;;  %v778_v47 = vsub.f32 %v774_v19, %v1699_v54  ;;  %v1055_v51 = vpop.eup %1054  ;;  %v847_v5 = vmul.f32 %v1053_v3, %v1674_v42 }
 0x176   :  { %1056 = vrcp.f32 %v779_v9  ;;  %v434_v50 = vmul.f32 0.25, %v430_v48  ;;  %v450_v10 = vsub.f32 0.0, %v444_v49  ;;  %v846_v46 = vmul.f32 %v1055_v51, %v1677_v29 }
 0x177   :  { %873 = vst [vmem:[#allocation5] sm:$0xff] %v1708_v15  ;;  %v796_v25 = vmul.f32 %v1049_v53, %v792_v7  ;;  %1058 = vrcp.f32 %v778_v47  ;;  %v851_v2 = vsub.f32 2.0, %v847_v5  ;;  %v426_v45 = vmul.f32 %v422_v21, %v406_v32 }
 0x178   :  { %v454_v58 = vmul.f32 %v450_v10, %v434_v50  ;;  %v850_v0 = vsub.f32 2.0, %v846_v46  ;;  %v571_v31 = vand.u32 2147483647, %v567_v12  ;;  %v839_v1 = vsub.f32 %v1674_v42, %v779_v9 }
 0x179   :  { %v800_v22 = vmul.f32 %v796_v25, %v1660_v63  ;;  %v838_v56 = vsub.f32 %v1677_v29, %v778_v47  ;;  %v855_v53 = vmul.f32 %v1053_v3, %v851_v2  ;;  %v878_v48 = vshrl.u32 %v877_v11, 7 }
 0x17a   :  { %v458_v43 = vsub.f32 %v454_v58, %v426_v45  ;;  %v854_v34 = vmul.f32 %v1055_v51, %v850_v0  ;;  %v575_v59 = vadd.f32 %v571_v31, %v1391_v41 }
 0x17b   :  { %v864_v33 = vsub.f32 %v800_v22, %v860_v14  ;;  %v859_v28 = vmul.f32 %v855_v53, %v839_v1  ;;  %v879_v18 = vadd.s32 8, %v878_v48 }
 0x17c   :  { %v1057_v24 = vpop.eup %1056  ;;  %v858_v19 = vmul.f32 %v854_v34, %v838_v56  ;;  %v867_v29 = vadd.f32 %v575_v59, %v459_v6  ;;  %v866_v37 = vadd.f32 %v1458_v44, %v458_v43 }
 0x17d   :  { %v1059_v17 = vpop.eup %1058  ;;  %v1722_v20 = vsub.f32 %v868_v55, %v864_v33  ;;  %v787_v63 = vmul.f32 %v1057_v24, %v779_v9 }
 0x17e   :  { %v786_v26 = vmul.f32 %v1059_v17, %v778_v47 }
 0x17f   :  { %876 = vst [vmem:[#allocation5 + $0x18] sm:$0xff] %v1722_v20  ;;  %v791_v52 = vsub.f32 2.0, %v787_v63 }
 0x180   :  { %v790_v61 = vsub.f32 2.0, %v786_v26 }
 0x181   :  { %v795_v13 = vmul.f32 %v1057_v24, %v791_v52 }
 0x182   :  { %v794_v40 = vmul.f32 %v1059_v17, %v790_v61 }
 0x183   :  { %v799_v36 = vmul.f32 %v795_v13, %v1696_v60 }
 0x184   :  { %v798_v8 = vmul.f32 %v794_v40, %v1699_v54 }
 0x185   :  { %v863_v42 = vsub.f32 %v799_v36, %v859_v28 }
 0x186   :  { %v862_v39 = vsub.f32 %v798_v8, %v858_v19 }
 0x187   :  { %v871_v35 = vsub.f32 %v867_v29, %v863_v42 }
 0x188   :  { %v870_v41 = vsub.f32 %v866_v37, %v862_v39 }
 0x189   :  { %875 = vst [vmem:[#allocation5 + $0x10] sm:$0xff] %v871_v35  ;;  %v902_v60 = vmin.f32 %v871_v35, %v1722_v20 }
 0x18a   :  { %874 = vst [vmem:[#allocation5 + $0x8] sm:$0xff] %v870_v41  ;;  %v880_v54 = vmin.f32 %v1708_v15, %v870_v41 }
 0x18b   :  { %v903_v9 = vrot.slane %v902_v60, 4  ;;  %939 = dma.vmem_to_hbm [thread:$0]  %s932_s17, 512, %s934_s20, [#allocation4], %s1148_s21, %s1148_s21, %s1149_s22  }
 0x18c   :  { %v881_v7 = vrot.slane %v880_v54, 4 }
 0x18d   :  { %v904_v47 = vmin.f32 %v902_v60, %v903_v9 }
 0x18e   :  { %v882_v3 = vmin.f32 %v880_v54, %v881_v7 }
 0x18f   :  { %v905_v44 = vrot.slane %v904_v47, 2 }
 0x190   :  { %v883_v23 = vrot.slane %v882_v3, 2 }
 0x191   :  { %v906_v49 = vmin.f32 %v904_v47, %v905_v44 }
 0x192   :  { %v884_v51 = vmin.f32 %v882_v3, %v883_v23 }
 0x193   :  { %v907_v16 = vrot.slane %v906_v49, 1 }
 0x194   :  { %v885_v25 = vrot.slane %v884_v51, 1 }
 0x195   :  { %v908_v4 = vmin.f32 %v906_v49, %v907_v16 }
 0x196   :  { %v886_v57 = vmin.f32 %v884_v51, %v885_v25 }
 0x197   :  { %vm909_vm1 = vcmp.le.f32.partialorder %v871_v35, %v908_v4  ;;  %vm910_vm2 = vcmp.le.f32.partialorder %v1722_v20, %v908_v4 }
 0x198   :  { %vm888_vm3 = vcmp.le.f32.partialorder %v870_v41, %v886_v57  ;;  %vm887_vm4 = vcmp.le.f32.partialorder %v1708_v15, %v886_v57  ;;  %v911_v30 = vsel %vm909_vm1, %v878_v48, 16  ;;  %v912_v38 = vsel %vm910_vm2, %v879_v18, 16 }
 0x199   :  { %v889_v32 = vsel %vm887_vm4, %v878_v48, 16  ;;  %v890_v5 = vsel %vm888_vm3, %v879_v18, 16  ;;  %vm913_vm5 = vcmp.lt.s32.totalorder %v911_v30, %v912_v38 }
 0x19a   :  { %vm891_vm6 = vcmp.lt.s32.totalorder %v889_v32, %v890_v5  ;;  %v914_v22 = vsel %vm913_vm5, %v911_v30, %v912_v38 }
 0x19b   :  { %v892_v14 = vsel %vm891_vm6, %v889_v32, %v890_v5  ;;  %v915_v21 = vrot.slane %v914_v22, 4 }
 0x19c   :  { %v893_v50 = vrot.slane %v892_v14, 4 }
 0x19d   :  { %vm916_vm7 = vcmp.lt.s32.totalorder %v914_v22, %v915_v21 }
 0x19e   :  { %vm894_vm8 = vcmp.lt.s32.totalorder %v892_v14, %v893_v50  ;;  %v917_v10 = vsel %vm916_vm7, %v914_v22, %v915_v21 }
 0x19f   :  { %v895_v46 = vsel %vm894_vm8, %v892_v14, %v893_v50  ;;  %v918_v12 = vrot.slane %v917_v10, 2 }
 0x1a0   :  { %v896_v33 = vrot.slane %v895_v46, 2 }
 0x1a1   :  { %vm919_vm9 = vcmp.lt.s32.totalorder %v917_v10, %v918_v12 }
 0x1a2   :  { %vm897_vm10 = vcmp.lt.s32.totalorder %v895_v46, %v896_v33  ;;  %v920_v55 = vsel %vm919_vm9, %v917_v10, %v918_v12 }
 0x1a3   :  { %v898_v15 = vsel %vm897_vm10, %v895_v46, %v896_v33  ;;  %v921_v24 = vrot.slane %v920_v55, 1 }
 0x1a4   :  { %v899_v62 = vrot.slane %v898_v15, 1 }
 0x1a5   :  { %vm922_vm11 = vcmp.lt.s32.totalorder %v920_v55, %v921_v24 }
 0x1a6   :  { %vm900_vm13 = vcmp.lt.s32.totalorder %v898_v15, %v899_v62  ;;  %v923_v17 = vsel %vm922_vm11, %v920_v55, %v921_v24 }
 0x1a7   :  { %v901_v2 = vsel %vm900_vm13, %v898_v15, %v899_v62 }
 0x1a8   :  { %v925_v20 = vsel %vm924_vm12, %v901_v2, %v923_v17 }
 0x1a9   :  { %926 = vst [vmem:[#allocation6] sm:$0x3] %v925_v20 }
 0x1aa   :  { %950 = dma.vmem_to_hbm [thread:$0]  %s946_s23, 32, %s948_s2, [#allocation7]  }
 0x1ab   :  { %1134 = dma.done.wait [#allocation4], 512  }
 0x1ac   :  { %1135 = vsyncadd [#allocation4], 4294966784 }
 0x1ad   :  { %1136 = dma.done.wait [#allocation7], 32  }
 0x1ae   :  { %1137 = vsyncadd [#allocation7], 4294967264 }
 0x1af   :  { %959 = vsyncpa [#allocation3], 1 }
 0x1b0   :  { %960 = vsyncpa [#allocation4], 1 }
 0x1b1   :  { %961 = vsyncpa [#allocation7], 1 }

</bundles_post_ra>
